<compile_context>
chip_gen: v5e
topology: v5e:2x2
jax: 0.10.0
libtpu: 0.0.40
codegen_flags: <defaults>
</compile_context>

<pallas_src>
from functools import partial

import jax
import jax.numpy as jnp
from jax.experimental import pallas as pl
from jax.experimental.pallas import tpu as pltpu


def _siamese_kernel(ids_ref, table_ref, wt_ref, b_ref, loss_ref, *, B, L):
    # ids_ref:   (3*B*L, 1) int32   -- [anchor rows | positive rows | negative rows]
    # table_ref: (VPAD, H)  float32 -- embedding table, zero-padded to VPAD (=128) rows
    # wt_ref:    (H, H)     float32 -- W already transposed (in_features, out_features)
    # b_ref:     (1, H)     float32 -- Linear bias
    N = ids_ref.shape[0]
    VPAD, H = table_ref.shape

    # --- fused embedding lookup: one-hot @ table on the MXU (K = 128, lane-dense) ---
    ids = ids_ref[...]                                            # (N, 1)
    iota = jax.lax.broadcasted_iota(jnp.int32, (N, VPAD), 1)      # (N, VPAD)
    onehot = (ids == iota).astype(jnp.float32)                    # (N, VPAD)
    emb = jnp.dot(onehot, table_ref[...],
                  preferred_element_type=jnp.float32)             # (N, H)

    # --- single Linear matmul for all three branches (no in-kernel transpose) ---
    y = jnp.dot(emb, wt_ref[...],
                preferred_element_type=jnp.float32)               # (N, H)

    # --- max_pool1d over the sequence axis; bias hoisted past the max ---
    # (N, H) -> (3B, L, H): L == 8 == sublane tile, so this is layout-friendly.
    pooled = jnp.max(y.reshape(3 * B, L, H), axis=1) + b_ref[...]  # (3B, H)

    # --- L2 normalize via rsqrt on the EUP (torch F.normalize, eps = 1e-12) ---
    sumsq = jnp.sum(pooled * pooled, axis=-1, keepdims=True)      # (3B, 1)
    v = pooled * jax.lax.rsqrt(jnp.maximum(sumsq, 1e-24))         # (3B, H)

    a = v[0:B]
    p = v[B:2 * B]
    n = v[2 * B:3 * B]

    # --- cosine triplet loss (margin=None path: +0.1, mean over positive entries) ---
    ap = 1.0 - jnp.sum(a * p, axis=-1, keepdims=True)             # (B, 1)
    an = 1.0 - jnp.sum(a * n, axis=-1, keepdims=True)             # (B, 1)
    diff = ap - an + 0.1
    pos = diff > 0.0
    s = jnp.sum(jnp.where(pos, diff, 0.0))
    cnt = jnp.sum(pos.astype(jnp.float32))
    # NaN when no triplet violates the margin -- matches torch.mean of an empty tensor.
    loss_ref[0, 0] = s / cnt


@jax.jit
def siamese_loss_pallas(ids_a, ids_p, ids_n, table, W, b):
    B, L = ids_a.shape
    V, H = table.shape
    VPAD = ((V + 127) // 128) * 128                               # lane-dense K for the gather matmul

    # Layout plumbing only (no compute hoisted out of the kernel):
    table_pad = jnp.zeros((VPAD, H), table.dtype).at[:V].set(table)
    ids_all = jnp.concatenate([ids_a, ids_p, ids_n], axis=0)      # (3B, L)
    ids_all = ids_all.reshape(3 * B * L, 1).astype(jnp.int32)     # (3*B*L, 1)
    wt = W.T                                                      # (in, out)

    # Tiny problem: single program, everything resident in VMEM (< a few tens of KiB).
    # TODO(synk): if B/L/H are scaled up, add a batch grid with dimension_semantics=
    # ("parallel",) and tile against v7x's 64 MiB VMEM instead of whole-array residency.
    out = pl.pallas_call(
        partial(_siamese_kernel, B=B, L=L),
        out_shape=jax.ShapeDtypeStruct((1, 1), jnp.float32),
        in_specs=[
            pl.BlockSpec(memory_space=pltpu.MemorySpace.VMEM),    # ids
            pl.BlockSpec(memory_space=pltpu.MemorySpace.VMEM),    # padded table
            pl.BlockSpec(memory_space=pltpu.MemorySpace.VMEM),    # W^T
            pl.BlockSpec(memory_space=pltpu.MemorySpace.VMEM),    # bias
        ],
        out_specs=pl.BlockSpec(memory_space=pltpu.MemorySpace.SMEM),
    )(ids_all, table_pad, wt, b)
    return out[0, 0]


def reference_loss(ids_a, ids_p, ids_n, table, W, b):
    # Pure-JAX reference of the PyTorch forward for validation.
    def enc(ids):
        e = jnp.take(table, ids, axis=0)                          # nn.Embedding
        y = jnp.einsum('blh,oh->blo', e, W,
                       precision=jax.lax.Precision.HIGHEST) + b   # nn.Linear
        return jnp.max(y, axis=1)                                 # max_pool1d over seq

    def norm(v):
        return v / jnp.maximum(jnp.linalg.norm(v, axis=-1, keepdims=True), 1e-12)

    a, p, n = norm(enc(ids_a)), norm(enc(ids_p)), norm(enc(ids_n))
    ap = 1.0 - jnp.sum(a * p, axis=-1)
    an = 1.0 - jnp.sum(a * n, axis=-1)
    diff = ap - an + 0.1
    pos = diff > 0.0
    return jnp.sum(jnp.where(pos, diff, 0.0)) / jnp.sum(pos.astype(jnp.float32))


if __name__ == "__main__":
    # config: hidden_size=32, vocab_size=30 (+1 for pad idx 0), max_length=8
    B, L, H, VOCAB = 4, 8, 32, 30

    key = jax.random.PRNGKey(0)
    k_emb, k_w, k_b, k_a, k_p, k_n = jax.random.split(key, 6)

    emb_table = jax.random.normal(k_emb, (VOCAB + 1, H), dtype=jnp.float32) * 0.1
    emb_table = emb_table.at[0].set(0.0)                          # padding_idx=0
    W = jax.random.normal(k_w, (H, H), dtype=jnp.float32) / jnp.sqrt(H)
    b = jax.random.normal(k_b, (1, H), dtype=jnp.float32) * 0.01

    ids_a = jax.random.randint(k_a, (B, L), 0, VOCAB + 1, dtype=jnp.int32)
    ids_p = jax.random.randint(k_p, (B, L), 0, VOCAB + 1, dtype=jnp.int32)
    ids_n = jax.random.randint(k_n, (B, L), 0, VOCAB + 1, dtype=jnp.int32)

    loss = siamese_loss_pallas(ids_a, ids_p, ids_n, emb_table, W, b)
    jax.block_until_ready(loss)

    ref = reference_loss(ids_a, ids_p, ids_n, emb_table, W, b)
    assert jnp.allclose(loss, ref, rtol=2e-3, atol=2e-3, equal_nan=True), (loss, ref)

    # TODO(synk): nn.Dropout(0.5) and nn.CosineEmbeddingLoss are declared in __init__
    # but never used in forward(), so they are intentionally omitted here.
    print("KERNEL_OK")
</pallas_src>

<mosaic_0001>
module attributes {stable_mosaic.version = 11 : i64} {
  func.func @_siamese_kernel(%arg0: memref<96x1xi32, #tpu.memory_space<vmem>>, %arg1: memref<128x32xf32, #tpu.memory_space<vmem>>, %arg2: memref<32x32xf32, #tpu.memory_space<vmem>>, %arg3: memref<1x32xf32, #tpu.memory_space<vmem>>, %arg4: memref<1x1xf32, #tpu.memory_space<smem>>) attributes {dimension_semantics = [], scalar_prefetch = 0 : i64, scratch_operands = 0 : i64, tpu.core_type = #tpu.core_type<tc>} {
    %c0 = arith.constant 0 : index
    %c0_0 = arith.constant 0 : index
    %0 = vector.load %arg0[%c0, %c0_0] : memref<96x1xi32, #tpu.memory_space<vmem>>, vector<96x1xi32>
    %1 = tpu.iota {dimensions = array<i32: 1>} : vector<96x128xi32>
    %2 = vector.broadcast %0 : vector<96x1xi32> to vector<96x128xi32>
    %3 = arith.cmpi eq, %2, %1 : vector<96x128xi32>
    %4 = arith.extui %3 : vector<96x128xi1> to vector<96x128xi32>
    %5 = arith.sitofp %4 : vector<96x128xi32> to vector<96x128xf32>
    %c0_1 = arith.constant 0 : index
    %c0_2 = arith.constant 0 : index
    %6 = vector.load %arg1[%c0_1, %c0_2] : memref<128x32xf32, #tpu.memory_space<vmem>>, vector<128x32xf32>
    %cst = arith.constant dense<0.000000e+00> : vector<96x32xf32>
    %7 = tpu.matmul %5, %6, %cst {dimension_numbers = #tpu.dot_dimension_numbers<[1], [0], [0], [1], [0, 0, 1, 1], [], []>} : vector<96x128xf32>, vector<128x32xf32>, vector<96x32xf32> -> vector<96x32xf32>
    %c0_3 = arith.constant 0 : index
    %c0_4 = arith.constant 0 : index
    %8 = vector.load %arg2[%c0_3, %c0_4] : memref<32x32xf32, #tpu.memory_space<vmem>>, vector<32x32xf32>
    %cst_5 = arith.constant dense<0.000000e+00> : vector<96x32xf32>
    %9 = tpu.matmul %7, %8, %cst_5 {dimension_numbers = #tpu.dot_dimension_numbers<[1], [0], [0], [1], [0, 0, 1, 1], [], []>} : vector<96x32xf32>, vector<32x32xf32>, vector<96x32xf32> -> vector<96x32xf32>
    %10 = vector.shape_cast %9 : vector<96x32xf32> to vector<12x8x32xf32>
    %cst_6 = arith.constant dense<0xFF800000> : vector<12x32xf32>
    %11 = vector.multi_reduction <maximumf>, %10, %cst_6 [1] : vector<12x8x32xf32> to vector<12x32xf32>
    %c0_7 = arith.constant 0 : index
    %c0_8 = arith.constant 0 : index
    %12 = vector.load %arg3[%c0_7, %c0_8] : memref<1x32xf32, #tpu.memory_space<vmem>>, vector<1x32xf32>
    %13 = vector.broadcast %12 : vector<1x32xf32> to vector<12x32xf32>
    %14 = arith.addf %11, %13 : vector<12x32xf32>
    %15 = arith.mulf %14, %14 : vector<12x32xf32>
    %cst_9 = arith.constant dense<0.000000e+00> : vector<12xf32>
    %16 = vector.multi_reduction <add>, %15, %cst_9 [1] : vector<12x32xf32> to vector<12xf32>
    %17 = vector.shape_cast %16 : vector<12xf32> to vector<12x1xf32>
    %cst_10 = arith.constant 1.000000e-24 : f32
    %18 = vector.broadcast %cst_10 : f32 to vector<12x1xf32>
    %19 = arith.maximumf %17, %18 : vector<12x1xf32>
    %20 = math.rsqrt %19 : vector<12x1xf32>
    %21 = vector.broadcast %20 : vector<12x1xf32> to vector<12x32xf32>
    %22 = arith.mulf %14, %21 : vector<12x32xf32>
    %23 = vector.extract_strided_slice %22 {offsets = [0, 0], sizes = [4, 32], strides = [1, 1]} : vector<12x32xf32> to vector<4x32xf32>
    %24 = vector.extract_strided_slice %22 {offsets = [4, 0], sizes = [4, 32], strides = [1, 1]} : vector<12x32xf32> to vector<4x32xf32>
    %25 = vector.extract_strided_slice %22 {offsets = [8, 0], sizes = [4, 32], strides = [1, 1]} : vector<12x32xf32> to vector<4x32xf32>
    %26 = arith.mulf %23, %24 : vector<4x32xf32>
    %cst_11 = arith.constant dense<0.000000e+00> : vector<4xf32>
    %27 = vector.multi_reduction <add>, %26, %cst_11 [1] : vector<4x32xf32> to vector<4xf32>
    %28 = vector.shape_cast %27 : vector<4xf32> to vector<4x1xf32>
    %cst_12 = arith.constant 1.000000e+00 : f32
    %29 = vector.broadcast %cst_12 : f32 to vector<4x1xf32>
    %30 = arith.subf %29, %28 : vector<4x1xf32>
    %31 = arith.mulf %23, %25 : vector<4x32xf32>
    %cst_13 = arith.constant dense<0.000000e+00> : vector<4xf32>
    %32 = vector.multi_reduction <add>, %31, %cst_13 [1] : vector<4x32xf32> to vector<4xf32>
    %33 = vector.shape_cast %32 : vector<4xf32> to vector<4x1xf32>
    %cst_14 = arith.constant 1.000000e+00 : f32
    %34 = vector.broadcast %cst_14 : f32 to vector<4x1xf32>
    %35 = arith.subf %34, %33 : vector<4x1xf32>
    %36 = arith.subf %30, %35 : vector<4x1xf32>
    %cst_15 = arith.constant 1.000000e-01 : f32
    %37 = vector.broadcast %cst_15 : f32 to vector<4x1xf32>
    %38 = arith.addf %36, %37 : vector<4x1xf32>
    %cst_16 = arith.constant 0.000000e+00 : f32
    %39 = vector.broadcast %cst_16 : f32 to vector<4x1xf32>
    %40 = arith.cmpf ogt, %38, %39 : vector<4x1xf32>
    %cst_17 = arith.constant 0.000000e+00 : f32
    %41 = vector.broadcast %cst_17 : f32 to vector<4x1xf32>
    %42 = arith.select %40, %38, %41 : vector<4x1xi1>, vector<4x1xf32>
    %43 = vector.shape_cast %42 : vector<4x1xf32> to vector<1x4x1xf32>
    %cst_18 = arith.constant dense<0.000000e+00> : vector<1xf32>
    %44 = vector.multi_reduction <add>, %43, %cst_18 [1, 2] : vector<1x4x1xf32> to vector<1xf32>
    %45 = vector.shape_cast %44 : vector<1xf32> to vector<1x1x1xf32>
    %46 = vector.extract %45[0, 0, 0] : f32 from vector<1x1x1xf32>
    %47 = arith.extui %40 : vector<4x1xi1> to vector<4x1xi32>
    %48 = arith.sitofp %47 : vector<4x1xi32> to vector<4x1xf32>
    %49 = vector.shape_cast %48 : vector<4x1xf32> to vector<1x4x1xf32>
    %cst_19 = arith.constant dense<0.000000e+00> : vector<1xf32>
    %50 = vector.multi_reduction <add>, %49, %cst_19 [1, 2] : vector<1x4x1xf32> to vector<1xf32>
    %51 = vector.shape_cast %50 : vector<1xf32> to vector<1x1x1xf32>
    %52 = vector.extract %51[0, 0, 0] : f32 from vector<1x1x1xf32>
    %53 = arith.divf %46, %52 : f32
    %c0_20 = arith.constant 0 : index
    %c0_21 = arith.constant 0 : index
    %54 = memref.load %arg4[%c0_20, %c0_21] : memref<1x1xf32, #tpu.memory_space<smem>>
    memref.store %53, %arg4[%c0_20, %c0_21] : memref<1x1xf32, #tpu.memory_space<smem>>
    return
  }
}

</mosaic_0001>

<bundles_post_ra>
// kernel: siamese_loss_pallas.1
= control target key start
LH: loop header
LB: loop body
LE: loop exit
PB: predicated region body
PF: predicated region fallthrough
CT: control target
= control target key end

     0   :  { %v691_v2 = vmov 0   ;;  %s922_s0 = inlined_call_operand.vmem [shape: s32[96,1], index: 0, kind: input, shape index: {}]   ;;  %s923_s1 = inlined_call_operand.vmem [shape: f32[128,32], index: 1, kind: input, shape index: {}]   ;;  %s924_s2 = inlined_call_operand.vmem [shape: f32[32,32], index: 2, kind: input, shape index: {}]   ;;  %s925_s3 = inlined_call_operand.vmem [shape: f32[1,32], index: 3, kind: input, shape index: {}]   ;;  %s926_s4 = inlined_call_operand.hbm [shape: f32[1,1], index: 4, kind: output, shape index: {}]  }
   0x1   :  { %v24_v0 = vld [vmem:[%s922_s0 + $0x30] sm:$0xff]  ;;  %v23_v1 = vld [vmem:[%s922_s0 + $0x28] sm:$0xff]  ;;  %668 = vset.pattern.permute.xlu1 %v691_v2  ;;  %667 = vset.pattern.permute.xlu0 %v691_v2  ;;  %v25_v3 = vld [vmem:[%s922_s0 + $0x38] sm:$0xff] }
   0x2   :  { %51 = vperm.xlu1 %668, %v24_v0   ;;  %48 = vperm.xlu0 %667, %v23_v1   ;;  %v119_v4 = vld [vmem:[%s923_s1 + $0x78] sm:$0xff]  ;;  %v118_v5 = vld [vmem:[%s923_s1 + $0x70] sm:$0xff]  ;;  %v117_v6 = vld [vmem:[%s923_s1 + $0x68] sm:$0xff] }
   0x3   :  { %669 = vset.pattern.permute.xlu2 %v691_v2  ;;  %621 = vmatpush.msra.mxu2 %v119_v4  ;;  %v19_v7 = vld [vmem:[%s922_s0 + $0x8] sm:$0xff]  ;;  %v18_v8 = vld [vmem:[%s922_s0] sm:$0xff] }
   0x4   :  { %54 = vperm.xlu2 %669, %v25_v3   ;;  %120 = vmatpush.msra.mxu0 %v119_v4  ;;  %v116_v9 = vld [vmem:[%s923_s1 + $0x60] sm:$0xff] }
   0x5   :  { %622 = vmatpush.msra.mxu3 %v119_v4  ;;  %623 = vmatpush.msra.mxu2 %v118_v5 }
   0x6   :  { %121 = vmatpush.msra.mxu0 %v118_v5 }
   0x7   :  { %624 = vmatpush.msra.mxu3 %v118_v5 }
   0x8   :  { %9 = vsyncpa [#allocation3], 0  ;;  %v20_v10 = vld [vmem:[%s922_s0 + $0x10] sm:$0xff]  ;;  %625 = vmatpush.msra.mxu2 %v117_v6  ;;  %122 = vmatpush.msra.mxu0 %v117_v6  ;;  %v115_v11 = vld [vmem:[%s923_s1 + $0x58] sm:$0xff]  ;;  %v30_v31 = vlaneseq  ;;  %v692_v35 = vmov 1.0   ;;  %vm177_vm12 = vcmask 261120  }
   0x9   :  { %v114_v12 = vld [vmem:[%s923_s1 + $0x50] sm:$0xff]  ;;  %626 = vmatpush.msra.mxu3 %v117_v6  ;;  %v113_v13 = vld [vmem:[%s923_s1 + $0x48] sm:$0xff]  ;;  %v21_v14 = vld [vmem:[%s922_s0 + $0x18] sm:$0xff]  ;;  %vm392_vm13 = vcmask 1041409   ;;  %vm395_vm14 = vcmask 1042434   ;;  %vm398_vm15 = vcmask 1043459  }
   0xa   :  { %36 = vperm.xlu1 %668, %v19_v7   ;;  %33 = vperm.xlu0 %667, %v18_v8   ;;  %v26_v15 = vld [vmem:[%s922_s0 + $0x40] sm:$0xff]  ;;  %v27_v17 = vld [vmem:[%s922_s0 + $0x48] sm:$0xff]  ;;  %v111_v18 = vld [vmem:[%s923_s1 + $0x38] sm:$0xff]  ;;  %v31_v33 = vand.u32 127, %v30_v31  ;;  %s574_s29 = sshll.u32 %s926_s4, 4  ;;  %s694_s6 = smov [#allocation2]   ;;  %s575_s29 = int_to_ptr.hbm [resolvable:$true] %s574_s29 }
   0xb   :  { %627 = vmatpush.msra.mxu2 %v116_v9  ;;  %123 = vmatpush.msra.mxu0 %v116_v9  ;;  %v112_v16 = vld [vmem:[%s923_s1 + $0x40] sm:$0xff]  ;;  %v110_v19 = vld [vmem:[%s923_s1 + $0x30] sm:$0xff]  ;;  %v109_v20 = vld [vmem:[%s923_s1 + $0x28] sm:$0xff] }
   0xc   :  { %39 = vperm.xlu2 %669, %v20_v10   ;;  %628 = vmatpush.msra.mxu3 %v116_v9  ;;  %v28_v21 = vld [vmem:[%s922_s0 + $0x50] sm:$0xff]  ;;  %v22_v22 = vld [vmem:[%s922_s0 + $0x20] sm:$0xff]  ;;  %v29_v23 = vld [vmem:[%s922_s0 + $0x58] sm:$0xff] }
   0xd   :  { %629 = vmatpush.msra.mxu2 %v115_v11  ;;  %124 = vmatpush.msra.mxu0 %v115_v11  ;;  %v108_v24 = vld [vmem:[%s923_s1 + $0x20] sm:$0xff]  ;;  %v107_v25 = vld [vmem:[%s923_s1 + $0x18] sm:$0xff]  ;;  %v106_v26 = vld [vmem:[%s923_s1 + $0x10] sm:$0xff] }
   0xe   :  { %630 = vmatpush.msra.mxu3 %v115_v11  ;;  %v105_v27 = vld [vmem:[%s923_s1 + $0x8] sm:$0xff]  ;;  %v104_v28 = vld [vmem:[%s923_s1] sm:$0xff]  ;;  %v176_v39 = vld [vmem:[%s924_s2 + $0x18] sm:$0xff] }
   0xf   :  { %631 = vmatpush.msra.mxu2 %v114_v12  ;;  %125 = vmatpush.msra.mxu0 %v114_v12  ;;  %v175_v40 = vld [vmem:[%s924_s2 + $0x10] sm:$0xff]  ;;  %v174_v46 = vld [vmem:[%s924_s2 + $0x8] sm:$0xff]  ;;  %v173_v47 = vld [vmem:[%s924_s2] sm:$0xff] }
  0x10   :  { %632 = vmatpush.msra.mxu3 %v114_v12  ;;  %226 = vmatpush.msra.mxu1 %v176_v39 }
  0x11   :  { %633 = vmatpush.msra.mxu2 %v113_v13  ;;  %126 = vmatpush.msra.mxu0 %v113_v13 }
  0x12   :  { %42 = vperm.xlu1 %668, %v21_v14   ;;  %57 = vperm.xlu0 %667, %v26_v15  }
  0x13   :  { %635 = vmatpush.msra.mxu2 %v112_v16  ;;  %127 = vmatpush.msra.mxu0 %v112_v16 }
  0x14   :  { %60 = vperm.xlu2 %669, %v27_v17   ;;  %634 = vmatpush.msra.mxu3 %v113_v13 }
  0x15   :  { %637 = vmatpush.msra.mxu2 %v111_v18  ;;  %128 = vmatpush.msra.mxu0 %v111_v18 }
  0x16   :  { %636 = vmatpush.msra.mxu3 %v112_v16  ;;  %227 = vmatpush.msra.mxu1 %v175_v40 }
  0x17   :  { %639 = vmatpush.msra.mxu2 %v110_v19  ;;  %129 = vmatpush.msra.mxu0 %v110_v19 }
  0x18   :  { %638 = vmatpush.msra.mxu3 %v111_v18  ;;  %228 = vmatpush.msra.mxu1 %v174_v46 }
  0x19   :  { %641 = vmatpush.msra.mxu2 %v109_v20  ;;  %130 = vmatpush.msra.mxu0 %v109_v20 }
  0x1a   :  { %63 = vperm.xlu1 %668, %v28_v21   ;;  %45 = vperm.xlu0 %667, %v22_v22  }
  0x1b   :  { %640 = vmatpush.msra.mxu3 %v110_v19  ;;  %643 = vmatpush.msra.mxu2 %v108_v24 }
  0x1c   :  { %66 = vperm.xlu2 %669, %v29_v23   ;;  %131 = vmatpush.msra.mxu0 %v108_v24 }
  0x1d   :  { %642 = vmatpush.msra.mxu3 %v109_v20  ;;  %645 = vmatpush.msra.mxu2 %v107_v25 }
  0x1e   :  { %132 = vmatpush.msra.mxu0 %v107_v25  ;;  %229 = vmatpush.msra.mxu1 %v173_v47 }
  0x1f   :  { %644 = vmatpush.msra.mxu3 %v108_v24  ;;  %647 = vmatpush.msra.mxu2 %v106_v26 }
  0x20   :  { %133 = vmatpush.msra.mxu0 %v106_v26 }
  0x21   :  { %646 = vmatpush.msra.mxu3 %v107_v25  ;;  %649 = vmatpush.msra.mxu2 %v105_v27 }
  0x22   :  { %134 = vmatpush.msra.mxu0 %v105_v27 }
  0x23   :  { %648 = vmatpush.msra.mxu3 %v106_v26  ;;  %651 = vmatpush.msra.mxu2 %v104_v28 }
  0x24   :  { %135 = vmatpush.msra.mxu0 %v104_v28 }
  0x25   :  { %650 = vmatpush.msra.mxu3 %v105_v27 }
  0x27   :  { %652 = vmatpush.msra.mxu3 %v104_v28 }
  0x29   :  { %653 = vmatpush.msrb.mxu3 %v176_v39 }
  0x2b   :  { %654 = vmatpush.msrb.mxu3 %v175_v40 }
  0x2d   :  { %655 = vmatpush.msrb.mxu3 %v174_v46 }
  0x2f   :  { %656 = vmatpush.msrb.mxu3 %v173_v47 }
  0x5e   :  { %v55_v29 = vpop.permute.xlu2 %54 }
  0x5f   :  { %vm75_vm4 = vcmp.eq.s32.totalorder %v55_v29, %v31_v33 }
  0x66   :  { %v40_v30 = vpop.permute.xlu2 %39 }
  0x67   :  { %vm70_vm6 = vcmp.eq.s32.totalorder %v40_v30, %v31_v33 }
  0x6e   :  { %v61_v32 = vpop.permute.xlu2 %60 }
  0x6f   :  { %vm77_vm8 = vcmp.eq.s32.totalorder %v61_v32, %v31_v33 }
  0x74   :  { %v49_v34 = vpop.permute.xlu0 %48  ;;  %v52_v37 = vpop.permute.xlu1 %51 }
  0x75   :  { %vm73_vm0 = vcmp.eq.s32.totalorder %v49_v34, %v31_v33  ;;  %vm74_vm2 = vcmp.eq.s32.totalorder %v52_v37, %v31_v33 }
  0x76   :  { %601 = vmatmul.msk.f32.vlgmr.msra.gmra.mxu2 %vm73_vm0, %v692_v35  ;;  %v67_v36 = vpop.permute.xlu2 %66  ;;  %vm423_vm0 = vcmask 257024  }
  0x77   :  { %vm79_vm1 = vcmp.eq.s32.totalorder %v67_v36, %v31_v33 }
  0x78   :  { %607 = vmatmul.msk.f32.vlgmr.msra.gmra.mxu3 %vm79_vm1, %v692_v35  ;;  %vm401_vm1 = vcmask 1044484  }
  0x7c   :  { %v34_v38 = vpop.permute.xlu0 %33  ;;  %v37_v41 = vpop.permute.xlu1 %36 }
  0x7d   :  { %vm68_vm3 = vcmp.eq.s32.totalorder %v34_v38, %v31_v33  ;;  %vm69_vm5 = vcmp.eq.s32.totalorder %v37_v41, %v31_v33 }
  0x7e   :  { %596 = vmatmul.msk.f32.vlgmr.msra.gmra.mxu0 %vm68_vm3, %v692_v35  ;;  %602 = vmatmul.msk.f32.gmra.mxu2 %vm74_vm2, %v692_v35  ;;  %vm404_vm2 = vcmask 1045509   ;;  %vm407_vm3 = vcmask 1046534  }
  0x84   :  { %v58_v42 = vpop.permute.xlu0 %57  ;;  %v43_v43 = vpop.permute.xlu1 %42 }
  0x85   :  { %vm76_vm7 = vcmp.eq.s32.totalorder %v58_v42, %v31_v33  ;;  %vm71_vm9 = vcmp.eq.s32.totalorder %v43_v43, %v31_v33 }
  0x86   :  { %597 = vmatmul.msk.f32.gmra.mxu0 %vm69_vm5, %v692_v35  ;;  %603 = vmatmul.msk.f32.gmra.mxu2 %vm75_vm4, %v692_v35  ;;  %vm410_vm4 = vcmask 1047559  }
  0x8c   :  { %v64_v44 = vpop.permute.xlu1 %63  ;;  %v46_v45 = vpop.permute.xlu0 %45 }
  0x8d   :  { %vm78_vm10 = vcmp.eq.s32.totalorder %v64_v44, %v31_v33  ;;  %vm72_vm11 = vcmp.eq.s32.totalorder %v46_v45, %v31_v33 }
  0x8e   :  { %598 = vmatmul.msk.f32.gmra.mxu0 %vm70_vm6, %v692_v35  ;;  %604 = vmatmul.msk.f32.gmra.mxu2 %vm76_vm7, %v692_v35 }
  0x96   :  { %599 = vmatmul.msk.f32.gmra.mxu0 %vm71_vm9, %v692_v35  ;;  %605 = vmatmul.msk.f32.gmra.mxu2 %vm77_vm8, %v692_v35 }
  0x9e   :  { %600 = vmatmul.msk.f32.gmra.mxu0 %vm72_vm11, %v692_v35  ;;  %606 = vmatmul.msk.f32.gmra.mxu2 %vm78_vm10, %v692_v35  ;;  %vm527_vm11 = vcmask 3072  }
  0xf9   :  { %v152_v48 = vpop.f32.mrf.mxu2 }
  0xfb   :  { %v137_v49 = vpop.f32.mrf.mxu0  ;;  %v170_v59 = vpop.f32.mrf.mxu3 }
  0xfc   :  { %608 = vmatmul.msk.f32.vlgmr.msra.gmra.mxu1 %vm177_vm12, %v137_v49 }
 0x101   :  { %v155_v50 = vpop.f32.mrf.mxu2 }
 0x103   :  { %v140_v51 = vpop.f32.mrf.mxu0 }
 0x104   :  { %609 = vmatmul.msk.f32.gmra.mxu1 %vm177_vm12, %v140_v51 }
 0x109   :  { %v158_v52 = vpop.f32.mrf.mxu2 }
 0x10b   :  { %v143_v53 = vpop.f32.mrf.mxu0 }
 0x10c   :  { %610 = vmatmul.msk.f32.gmra.mxu1 %vm177_vm12, %v143_v53 }
 0x111   :  { %v161_v54 = vpop.f32.mrf.mxu2 }
 0x112   :  { %616 = vmatmul.msk.f32.vlgmr.msrb.gmra.mxu3 %vm177_vm12, %v161_v54 }
 0x113   :  { %v146_v55 = vpop.f32.mrf.mxu0 }
 0x114   :  { %611 = vmatmul.msk.f32.gmra.mxu1 %vm177_vm12, %v146_v55 }
 0x119   :  { %v164_v56 = vpop.f32.mrf.mxu2 }
 0x11a   :  { %617 = vmatmul.msk.f32.gmra.mxu3 %vm177_vm12, %v164_v56 }
 0x11b   :  { %v149_v57 = vpop.f32.mrf.mxu0 }
 0x11c   :  { %612 = vmatmul.msk.f32.gmra.mxu1 %vm177_vm12, %v149_v57 }
 0x121   :  { %v167_v58 = vpop.f32.mrf.mxu2 }
 0x122   :  { %618 = vmatmul.msk.f32.gmra.mxu3 %vm177_vm12, %v167_v58 }
 0x124   :  { %613 = vmatmul.msk.f32.gmra.mxu1 %vm177_vm12, %v152_v48 }
 0x12a   :  { %619 = vmatmul.msk.f32.gmra.mxu3 %vm177_vm12, %v170_v59 }
 0x12c   :  { %614 = vmatmul.msk.f32.gmra.mxu1 %vm177_vm12, %v155_v50 }
 0x134   :  { %615 = vmatmul.msk.f32.gmra.mxu1 %vm177_vm12, %v158_v52 }
 0x179   :  { %v231_v60 = vpop.f32.mrf.mxu1 }
 0x17a   :  { %v267_v9 = vsel %vm177_vm12, %v231_v60, -inf }
 0x17b   :  { %v268_v16 = vrot.slane %v267_v9, 4 }
 0x17d   :  { %v269_v26 = vmax.f32 %v267_v9, %v268_v16 }
 0x17f   :  { %v270_v38 = vrot.slane %v269_v26, 2 }
 0x181   :  { %v234_v61 = vpop.f32.mrf.mxu1  ;;  %v271_v52 = vmax.f32 %v269_v26, %v270_v38 }
 0x182   :  { %v274_v1 = vsel %vm177_vm12, %v234_v61, -inf }
 0x183   :  { %v275_v2 = vrot.slane %v274_v1, 4 }
 0x185   :  { %v276_v10 = vmax.f32 %v274_v1, %v275_v2 }
 0x187   :  { %v277_v19 = vrot.slane %v276_v10, 2 }
 0x189   :  { %v237_v62 = vpop.f32.mrf.mxu1  ;;  %v278_v30 = vmax.f32 %v276_v10, %v277_v19 }
 0x18a   :  { %v281_v3 = vsel %vm177_vm12, %v237_v62, -inf }
 0x18b   :  { %v282_v7 = vrot.slane %v281_v3, 4  ;;  %v279_v45 = vrot.slane %v278_v30, 1 }
 0x18d   :  { %v283_v17 = vmax.f32 %v281_v3, %v282_v7  ;;  %v280_v59 = vmax.f32 %v278_v30, %v279_v45  ;;  %v272_v3 = vrot.slane %v271_v52, 1 }
 0x18f   :  { %v284_v27 = vrot.slane %v283_v17, 2 }
 0x191   :  { %v240_v63 = vpop.f32.mrf.mxu1  ;;  %v285_v39 = vmax.f32 %v283_v17, %v284_v27 }
 0x192   :  { %v288_v4 = vsel %vm177_vm12, %v240_v63, -inf }
 0x193   :  { %v289_v8 = vrot.slane %v288_v4, 4  ;;  %v286_v53 = vrot.slane %v285_v39, 1 }
 0x195   :  { %v255_v0 = vpop.f32.mrf.mxu3  ;;  %v290_v18 = vmax.f32 %v288_v4, %v289_v8  ;;  %v670_v4 = vld [vmem:[%s925_s3] ss:$0 sm:$0xff] }
 0x196   :  { %v323_v12 = vsel %vm177_vm12, %v255_v0, -inf }
 0x197   :  { %v324_v20 = vrot.slane %v323_v12, 4  ;;  %v291_v28 = vrot.slane %v290_v18, 2 }
 0x199   :  { %v243_v5 = vpop.f32.mrf.mxu1  ;;  %v325_v31 = vmax.f32 %v323_v12, %v324_v20  ;;  %v292_v40 = vmax.f32 %v290_v18, %v291_v28  ;;  %v842_v12 = vadd.f32 %v670_v4, %v280_v59  ;;  %v273_v20 = vmax.f32 %v271_v52, %v272_v3 }
 0x19a   :  { %v295_v6 = vsel %vm177_vm12, %v243_v5, -inf  ;;  %v287_v5 = vmax.f32 %v285_v39, %v286_v53 }
 0x19b   :  { %v296_v13 = vrot.slane %v295_v6, 4  ;;  %v326_v42 = vrot.slane %v325_v31, 2  ;;  %v293_v54 = vrot.slane %v292_v40, 1  ;;  %v368_v28 = vmul.f32 %v842_v12, %v842_v12 }
 0x19d   :  { %v258_v11 = vpop.f32.mrf.mxu3  ;;  %v297_v23 = vmax.f32 %v295_v6, %v296_v13  ;;  %v327_v55 = vmax.f32 %v325_v31, %v326_v42  ;;  %v294_v6 = vmax.f32 %v292_v40, %v293_v54  ;;  %v391_v42 = vrot.slane %v368_v28, 7 }
 0x19e   :  { %v330_v14 = vsel %vm177_vm12, %v258_v11, -inf }
 0x19f   :  { %v331_v15 = vrot.slane %v330_v14, 4  ;;  %v298_v33 = vrot.slane %v297_v23, 2  ;;  %v328_v7 = vrot.slane %v327_v55, 1 }
 0x1a1   :  { %v332_v21 = vmax.f32 %v330_v14, %v331_v15  ;;  %v246_v22 = vpop.f32.mrf.mxu1  ;;  %v299_v46 = vmax.f32 %v297_v23, %v298_v33 }
 0x1a2   :  { %v302_v24 = vsel %vm177_vm12, %v246_v22, -inf  ;;  %v849_v22 = vadd.f32 %v670_v4, %v294_v6 }
 0x1a3   :  { %v333_v25 = vrot.slane %v332_v21, 2  ;;  %v303_v29 = vrot.slane %v302_v24, 4  ;;  %v300_v60 = vrot.slane %v299_v46, 1 }
 0x1a4   :  { %v370_v38 = vmul.f32 %v849_v22, %v849_v22 }
 0x1a5   :  { %v261_v32 = vpop.f32.mrf.mxu3  ;;  %v334_v34 = vmax.f32 %v332_v21, %v333_v25  ;;  %v304_v35 = vmax.f32 %v302_v24, %v303_v29  ;;  %v301_v13 = vmax.f32 %v299_v46, %v300_v60  ;;  %v847_v21 = vadd.f32 %v670_v4, %v287_v5 }
 0x1a6   :  { %v337_v36 = vsel %vm177_vm12, %v261_v32, -inf  ;;  %v329_v24 = vmax.f32 %v327_v55, %v328_v7  ;;  %v397_v52 = vrot.slane %v370_v38, 5 }
 0x1a7   :  { %v338_v37 = vrot.slane %v337_v36, 4  ;;  %v305_v41 = vrot.slane %v304_v35, 2  ;;  %v335_v47 = vrot.slane %v334_v34, 1  ;;  %v855_v29 = vadd.f32 %v670_v4, %v301_v13 }
 0x1a8   :  { %v871_v39 = vadd.f32 %v670_v4, %v329_v24 }
 0x1a9   :  { %v339_v43 = vmax.f32 %v337_v36, %v338_v37  ;;  %v249_v44 = vpop.f32.mrf.mxu1  ;;  %v306_v49 = vmax.f32 %v304_v35, %v305_v41  ;;  %v336_v61 = vmax.f32 %v334_v34, %v335_v47  ;;  %v861_v34 = vadd.f32 %v670_v4, %v273_v20 }
 0x1aa   :  { %v309_v48 = vsel %vm177_vm12, %v249_v44, -inf  ;;  %v369_v35 = vmul.f32 %v847_v21, %v847_v21  ;;  %v375_v53 = vmul.f32 %v871_v39, %v871_v39 }
 0x1ab   :  { %v340_v50 = vrot.slane %v339_v43, 2  ;;  %v310_v51 = vrot.slane %v309_v48, 4  ;;  %v307_v63 = vrot.slane %v306_v49, 1  ;;  %v844_v14 = vadd.f32 %v670_v4, %v336_v61 }
 0x1ad   :  { %v341_v56 = vmax.f32 %v339_v43, %v340_v50  ;;  %v311_v57 = vmax.f32 %v309_v48, %v310_v51  ;;  %v264_v58 = vpop.f32.mrf.mxu3  ;;  %v308_v16 = vmax.f32 %v306_v49, %v307_v63  ;;  %v376_v30 = vmul.f32 %v844_v14, %v844_v14 }
 0x1ae   :  { %v344_v62 = vsel %vm177_vm12, %v264_v58, -inf  ;;  %v371_v43 = vmul.f32 %v855_v29, %v855_v29  ;;  %v367_v48 = vmul.f32 %v861_v34, %v861_v34  ;;  %v394_v49 = vrot.slane %v369_v35, 6 }
 0x1af   :  { %v342_v0 = vrot.slane %v341_v56, 1  ;;  %v312_v1 = vrot.slane %v311_v57, 2  ;;  %v345_v2 = vrot.slane %v344_v62, 4  ;;  %v859_v31 = vadd.f32 %v670_v4, %v308_v16 }
 0x1b0   :  { %v412_v44 = vrot.slane %v376_v30, 7 }
 0x1b1   :  { %v343_v8 = vmax.f32 %v341_v56, %v342_v0  ;;  %v313_v9 = vmax.f32 %v311_v57, %v312_v1  ;;  %v346_v10 = vmax.f32 %v344_v62, %v345_v2  ;;  %v252_v11 = vpop.f32.mrf.mxu1  ;;  %v372_v45 = vmul.f32 %v859_v31, %v859_v31 }
 0x1b2   :  { %v316_v15 = vsel %vm177_vm12, %v252_v11, -inf  ;;  %v400_v56 = vrot.slane %v371_v43, 4  ;;  %v393_v57 = vsel %vm392_vm13, %v391_v42, %v367_v48  ;;  %v413_v60 = vsel %vm392_vm13, %v412_v44, %v375_v53 }
 0x1b3   :  { %v314_v17 = vrot.slane %v313_v9, 1  ;;  %v347_v18 = vrot.slane %v346_v10, 2  ;;  %v317_v19 = vrot.slane %v316_v15, 4  ;;  %v851_v23 = vadd.f32 %v670_v4, %v343_v8 }
 0x1b4   :  { %v403_v58 = vrot.slane %v372_v45, 3  ;;  %v396_v62 = vsel %vm395_vm14, %v394_v49, %v393_v57 }
 0x1b5   :  { %v315_v25 = vmax.f32 %v313_v9, %v314_v17  ;;  %v348_v26 = vmax.f32 %v346_v10, %v347_v18  ;;  %v318_v27 = vmax.f32 %v316_v15, %v317_v19  ;;  %v377_v37 = vmul.f32 %v851_v23, %v851_v23 }
 0x1b6   :  { %v399_v1 = vsel %vm398_vm15, %v397_v52, %v396_v62 }
 0x1b7   :  { %v349_v32 = vrot.slane %v348_v26, 1  ;;  %v319_v33 = vrot.slane %v318_v27, 2  ;;  %v865_v36 = vadd.f32 %v670_v4, %v315_v25  ;;  %v414_v50 = vrot.slane %v377_v37, 6 }
 0x1b8   :  { %v402_v5 = vsel %vm401_vm1, %v400_v56, %v399_v1 }
 0x1b9   :  { %v350_v40 = vmax.f32 %v348_v26, %v349_v32  ;;  %v320_v41 = vmax.f32 %v318_v27, %v319_v33  ;;  %v373_v51 = vmul.f32 %v865_v36, %v865_v36  ;;  %v415_v63 = vsel %vm395_vm14, %v414_v50, %v413_v60 }
 0x1ba   :  { %v405_v6 = vsel %vm404_vm2, %v403_v58, %v402_v5 }
 0x1bb   :  { %v877_v46 = vadd.f32 %v670_v4, %v350_v40  ;;  %v321_v47 = vrot.slane %v320_v41, 1  ;;  %v406_v0 = vrot.slane %v373_v51, 2 }
 0x1bd   :  { %v322_v54 = vmax.f32 %v320_v41, %v321_v47  ;;  %v378_v55 = vmul.f32 %v877_v46, %v877_v46  ;;  %v408_v8 = vsel %vm407_vm3, %v406_v0, %v405_v6 }
 0x1bf   :  { %v888_v59 = vadd.f32 %v670_v4, %v322_v54  ;;  %v416_v61 = vrot.slane %v378_v55, 5 }
 0x1c1   :  { %v417_v2 = vsel %vm398_vm15, %v416_v61, %v415_v63  ;;  %v374_v3 = vmul.f32 %v888_v59, %v888_v59 }
 0x1c2   :  { %v424_v4 = vsel %vm423_vm0, %v417_v2, 0.0 }
 0x1c3   :  { %425 = vadd.xlane.f32.xlu1 %v424_v4  ;;  %v409_v7 = vrot.slane %v374_v3, 1 }
 0x1c5   :  { %v411_v9 = vsel %vm410_vm4, %v409_v7, %v408_v8 }
 0x1c6   :  { %v420_v10 = vsel %vm177_vm12, %v411_v9, 0.0 }
 0x1c7   :  { %421 = vadd.xlane.f32.xlu0 %v420_v10 }
 0x236   :  { %v426_v11 = vpop.xlane.xlu1 %425 }
 0x237   :  { %v428_v13 = vmax.f32 %v426_v11, 1e-24 }
 0x239   :  { %671 = vrsqrt.f32 %v428_v13  ;;  %vm445_vm6 = vweird.f32 %v428_v13 }
 0x23a   :  { %v422_v15 = vpop.xlane.xlu0 %421 }
 0x23b   :  { %v427_v16 = vmax.f32 %v422_v15, 1e-24 }
 0x23d   :  { %673 = vrsqrt.f32 %v427_v16  ;;  %vm435_vm9 = vweird.f32 %v427_v16 }
 0x23f   :  { %v672_v17 = vpop.eup %671 }
 0x240   :  { %v440_v18 = vmul.f32 %v672_v17, %v428_v13  ;;  %vm446_vm5 = vweird.f32 %v672_v17 }
 0x241   :  { %vm447_vm7 = vmor %vm445_vm6, %vm446_vm5 }
 0x242   :  { %v441_v19 = vmul.f32 %v672_v17, %v440_v18 }
 0x243   :  { %v674_v20 = vpop.eup %673 }
 0x244   :  { %v442_v24 = vmul.f32 0.5, %v441_v19  ;;  %v430_v25 = vmul.f32 %v674_v20, %v427_v16  ;;  %vm436_vm8 = vweird.f32 %v674_v20 }
 0x245   :  { %vm437_vm10 = vmor %vm435_vm9, %vm436_vm8 }
 0x246   :  { %v443_v26 = vsub.f32 1.5, %v442_v24  ;;  %v431_v27 = vmul.f32 %v674_v20, %v430_v25 }
 0x248   :  { %v444_v28 = vmul.f32 %v672_v17, %v443_v26  ;;  %v432_v30 = vmul.f32 0.5, %v431_v27 }
 0x24a   :  { %v448_v32 = vsel %vm447_vm7, %v672_v17, %v444_v28  ;;  %v433_v33 = vsub.f32 1.5, %v432_v30  ;;  %v693_v17 = vmov 0.0  }
 0x24b   :  { %v458_v37 = vrot.slane %v448_v32, 1  ;;  %v459_v38 = vrot.slane %v448_v32, 2  ;;  %v460_v57 = vrot.slane %v448_v32, 3 }
 0x24c   :  { %v434_v35 = vmul.f32 %v674_v20, %v433_v33 }
 0x24d   :  { %v482_v52 = vmul.f32 %v458_v37, %v844_v14  ;;  %v483_v58 = vmul.f32 %v459_v38, %v851_v23 }
 0x24e   :  { %v438_v40 = vsel %vm437_vm10, %v674_v20, %v434_v35 }
 0x24f   :  { %v451_v41 = vrot.slane %v438_v40, 1  ;;  %v452_v42 = vrot.slane %v438_v40, 2  ;;  %v453_v43 = vrot.slane %v438_v40, 3  ;;  %v454_v44 = vrot.slane %v438_v40, 4 }
 0x250   :  { %v455_v45 = vrot.slane %v438_v40, 5  ;;  %v456_v47 = vrot.slane %v438_v40, 6  ;;  %v457_v48 = vrot.slane %v438_v40, 7 }
 0x251   :  { %v474_v49 = vmul.f32 %v451_v41, %v842_v12  ;;  %v475_v50 = vmul.f32 %v452_v42, %v847_v21  ;;  %v476_v51 = vmul.f32 %v453_v43, %v849_v22  ;;  %v477_v53 = vmul.f32 %v454_v44, %v855_v29 }
 0x252   :  { %v478_v54 = vmul.f32 %v455_v45, %v859_v31  ;;  %v479_v55 = vmul.f32 %v456_v47, %v865_v36  ;;  %v480_v56 = vmul.f32 %v457_v48, %v888_v59  ;;  %v473_v12 = vmul.f32 %v438_v40, %v861_v34 }
 0x253   :  { %v505_v60 = vmul.f32 %v482_v52, %v474_v49  ;;  %v481_v22 = vmul.f32 %v448_v32, %v871_v39  ;;  %v506_v14 = vmul.f32 %v483_v58, %v475_v50  ;;  %v484_v59 = vmul.f32 %v460_v57, %v877_v46 }
 0x254   :  { %v486_v61 = vmul.f32 %v478_v54, %v474_v49  ;;  %v487_v21 = vmul.f32 %v479_v55, %v475_v50  ;;  %v488_v62 = vmul.f32 %v480_v56, %v476_v51  ;;  %v485_v63 = vmul.f32 %v477_v53, %v473_v12 }
 0x255   :  { %v512_v31 = vrot.slane %v505_v60, 7  ;;  %v504_v2 = vmul.f32 %v481_v22, %v473_v12  ;;  %v514_v3 = vrot.slane %v506_v14, 6  ;;  %v507_v4 = vmul.f32 %v484_v59, %v476_v51 }
 0x256   :  { %v493_v29 = vrot.slane %v486_v61, 7  ;;  %v495_v0 = vrot.slane %v487_v21, 6  ;;  %v497_v1 = vrot.slane %v488_v62, 5 }
 0x257   :  { %v513_v5 = vsel %vm392_vm13, %v512_v31, %v504_v2  ;;  %v516_v7 = vrot.slane %v507_v4, 5 }
 0x258   :  { %v494_v36 = vsel %vm392_vm13, %v493_v29, %v485_v63  ;;  %v515_v6 = vsel %vm395_vm14, %v514_v3, %v513_v5 }
 0x259   :  { %v496_v23 = vsel %vm395_vm14, %v495_v0, %v494_v36  ;;  %v517_v8 = vsel %vm398_vm15, %v516_v7, %v515_v6 }
 0x25a   :  { %v498_v34 = vsel %vm398_vm15, %v497_v1, %v496_v23  ;;  %v519_v9 = vsel %vm423_vm0, %v517_v8, 0.0 }
 0x25b   :  { %v500_v39 = vsel %vm423_vm0, %v498_v34, 0.0 }
 0x25c   :  { %501 = vadd.xlane.f32.xlu2 %v500_v39 }
 0x264   :  { %520 = vadd.xlane.f32.xlu2 %v519_v9 }
 0x2cf   :  { %v502_v46 = vpop.xlane.xlu2 %501 }
 0x2d0   :  { %v503_v11 = vsub.f32 1.0, %v502_v46 }
 0x2d7   :  { %v521_v10 = vpop.xlane.xlu2 %520 }
 0x2d8   :  { %v522_v13 = vsub.f32 1.0, %v521_v10 }
 0x2da   :  { %v523_v15 = vsub.f32 %v503_v11, %v522_v13 }
 0x2dc   :  { %v524_v16 = vadd.f32 0.1, %v523_v15 }
 0x2de   :  { %vm525_vm12 = vcmp.gt.f32.partialorder %v524_v16, 0.0 }
 0x2df   :  { %v620_v18 = vsel %vm525_vm12, 1.0, %v693_v17  ;;  %v526_v19 = vsel %vm525_vm12, %v524_v16, 0.0 }
 0x2e0   :  { %v540_v20 = vsel %vm527_vm11, %v620_v18, 0.0  ;;  %v528_v24 = vsel %vm527_vm11, %v526_v19, 0.0 }
 0x2e1   :  { %541 = vadd.xlane.f32.xlu1 %v540_v20  ;;  %529 = vadd.xlane.f32.xlu0 %v528_v24 }
 0x354   :  { %v542_v25 = vpop.xlane.xlu1 %541  ;;  %v530_v26 = vpop.xlane.xlu0 %529 }
 0x355   :  { %v543_v27 = vrot.slane %v542_v25, 4  ;;  %v531_v28 = vrot.slane %v530_v26, 4 }
 0x357   :  { %v544_v30 = vadd.f32 %v543_v27, %v542_v25  ;;  %v532_v32 = vadd.f32 %v531_v28, %v530_v26 }
 0x359   :  { %v545_v33 = vrot.slane %v544_v30, 2  ;;  %v533_v35 = vrot.slane %v532_v32, 2 }
 0x35b   :  { %v546_v37 = vadd.f32 %v545_v33, %v544_v30  ;;  %v534_v38 = vadd.f32 %v533_v35, %v532_v32 }
 0x35d   :  { %v535_v40 = vrot.slane %v534_v38, 1  ;;  %v547_v41 = vrot.slane %v546_v37, 1 }
 0x35f   :  { %v536_v42 = vadd.f32 %v535_v40, %v534_v38  ;;  %v548_v43 = vadd.f32 %v547_v41, %v546_v37 }
 0x361   :  { %657 = vpush %v536_v42 }
 0x362   :  { %659 = vpush %v548_v43 }
 0x392   :  { %s658_s3 = spop %657 }
 0x393   :  { %s660_s26 = spop %659 }
 0x394   :  { %v550_v44 = vstv %s660_s26 }
 0x395   :  { %675 = vrcp.f32 %v550_v44  ;;  %v562_v49 = vand.u32 2147483648, %v550_v44  ;;  %v560_v51 = vand.u32 2147483647, %v550_v44  ;;  %vm556_vm14 = vweird.f32 %v550_v44 }
 0x397   :  { %v563_v53 = vor.u32 1.1754944e-38, %v562_v49  ;;  %vm561_vm0 = vcmp.eq.f32.partialorder %v560_v51, 8.507059e+37 }
 0x39b   :  { %v676_v45 = vpop.eup %675 }
 0x39c   :  { %v552_v47 = vmul.f32 %v676_v45, %v550_v44  ;;  %vm557_vm13 = vweird.f32 %v676_v45 }
 0x39d   :  { %vm558_vm15 = vmor %vm556_vm14, %vm557_vm13 }
 0x39e   :  { %v553_v48 = vsub.f32 1.0, %v552_v47 }
 0x3a0   :  { %v554_v50 = vmul.f32 %v676_v45, %v553_v48 }
 0x3a2   :  { %v555_v52 = vadd.f32 %v676_v45, %v554_v50 }
 0x3a4   :  { %v559_v54 = vsel %vm558_vm15, %v676_v45, %v555_v52 }
 0x3a5   :  { %v564_v55 = vsel %vm561_vm0, %v563_v53, %v559_v54 }
 0x3a6   :  { %661 = vpush %v564_v55 }
 0x3d7   :  { %s662_s30 = spop %661 }
 0x3d8   :  { %s566_s5 = smul.f32 %s662_s30, %s658_s3 }
 0x3da   :  { %568 = sst [smem:[#allocation2]] %s566_s5 }
 0x3db   :  { %577 = dma.smem_to_hbm %s694_s6, 16, %s575_s29, [#allocation3]  }
 0x3dc   :  { %689 = dma.done.wait [#allocation3], 16  }
 0x3dd   :  { %690 = vsyncadd [#allocation3], 4294967280 }
 0x3de   :  { %582 = sfence }
 0x3df   :  { %583 = vsyncpa [#allocation3], 1 }

</bundles_post_ra>
